<compile_context>
chip_gen: v6e
topology: v6e:2x2x1
jax: 0.10.0
libtpu: 0.0.40
codegen_flags: <defaults>
</compile_context>

<pallas_src>
import jax
import jax.numpy as jnp
from jax.experimental import pallas as pl
from jax.experimental.pallas import tpu as pltpu

LANE = 128  # TPU lane width


def _round_up(n, m):
    return ((n + m - 1) // m) * m


def _mlp_kernel(x_ref, w1_ref, b1_ref, w2_ref, b2_ref, w3_ref, b3_ref, o_ref):
    # Fused 3-layer MLP on one batch tile. x arrives f32 (no separate XLA cast
    # pass); cast to bf16 on the VPU -- it hides under the HBM DMA since the
    # kernel is memory bound. All matmuls accumulate in f32 on the MXU.
    x = x_ref[...].astype(jnp.bfloat16)
    h1 = jnp.dot(x, w1_ref[...], preferred_element_type=jnp.float32)
    h1 = jnp.maximum(h1 + b1_ref[...], 0.0)          # ReLU (Dropout = identity in eval)

    h2 = jnp.dot(h1.astype(jnp.bfloat16), w2_ref[...],
                 preferred_element_type=jnp.float32)
    h2 = jnp.maximum(h2 + b2_ref[...], 0.0)          # ReLU (Dropout = identity in eval)

    out = jnp.dot(h2.astype(jnp.bfloat16), w3_ref[...],
                  preferred_element_type=jnp.float32)
    o_ref[...] = (out + b3_ref[...]).astype(o_ref.dtype)


def prepare_params(params):
    """One-time parameter prep: pad narrow dims to 128 lanes, cast weights to bf16.

    params: dict of w1,b1,w2,b2,w3,b3 in f32, weights as [in, out].
    Zero padding is numerically inert (zeros through ReLU; zero rows/cols in w3).
    """
    w1, b1 = params["w1"], params["b1"]   # [F, 256],  [1, 256]
    w2, b2 = params["w2"], params["b2"]   # [256, 64], [1, 64]
    w3, b3 = params["w3"], params["b3"]   # [64, C],   [1, C]
    H2, C = w2.shape[1], w3.shape[1]
    H2p = _round_up(H2, LANE)             # 64 -> 128
    Cp = _round_up(C, LANE)               # C  -> 128
    return dict(
        w1=w1.astype(jnp.bfloat16),
        b1=b1.astype(jnp.float32),
        w2=jnp.pad(w2, ((0, 0), (0, H2p - H2))).astype(jnp.bfloat16),
        b2=jnp.pad(b2, ((0, 0), (0, H2p - H2))).astype(jnp.float32),
        w3=jnp.pad(w3, ((0, H2p - H2), (0, Cp - C))).astype(jnp.bfloat16),
        b3=jnp.pad(b3, ((0, 0), (0, Cp - C))).astype(jnp.float32),
        num_classes=C,
    )


def classifier_forward(x, prepared, *, batch_tile=1024):
    """x: [B, num_features] f32. prepared: output of prepare_params().

    Returns [B, num_classes] f32 logits.
    """
    B, F = x.shape
    w1, b1 = prepared["w1"], prepared["b1"]
    w2, b2 = prepared["w2"], prepared["b2"]
    w3, b3 = prepared["w3"], prepared["b3"]
    C = prepared["num_classes"]
    H1, H2p, Cp = w1.shape[1], w2.shape[1], w3.shape[1]

    # ---- batch tile selection ----
    # Big tile to amortize per-grid-step overhead (1024 default; still well
    # under v5e's 16 MiB scoped VMEM: ~7 MiB with double-buffered x/out and
    # f32 intermediates).  Rounded to 16 rows (bf16 sublane packing).  For
    # moderate/large B, cap at ~B/2 so the grid has >= 2 parallel steps and
    # both TensorCores get work on v7x.
    bt = min(batch_tile, _round_up(B, 16))
    if B >= 256:
        bt = min(bt, _round_up((B + 1) // 2, 128))
    B_pad = _round_up(B, bt)
    x_p = jnp.pad(x, ((0, B_pad - B), (0, 0))) if B_pad != B else x

    grid = (B_pad // bt,)

    flops = 2 * B_pad * (F * H1 + H1 * H2p + H2p * Cp)
    bytes_accessed = (B_pad * F * 4            # x (f32 in)
                      + B_pad * Cp * 2         # logits (bf16 out)
                      + (F * H1 + H1 * H2p + H2p * Cp) * 2   # bf16 weights
                      + (H1 + H2p + Cp) * 4)   # f32 biases

    out_padded = pl.pallas_call(
        _mlp_kernel,
        out_shape=jax.ShapeDtypeStruct((B_pad, Cp), jnp.bfloat16),
        grid_spec=pltpu.PrefetchScalarGridSpec(
            num_scalar_prefetch=0,
            grid=grid,
            in_specs=[
                pl.BlockSpec((bt, F), lambda i: (i, 0)),     # x tile (streamed, f32)
                pl.BlockSpec((F, H1), lambda i: (0, 0)),     # w1 (resident bf16)
                pl.BlockSpec((1, H1), lambda i: (0, 0)),     # b1
                pl.BlockSpec((H1, H2p), lambda i: (0, 0)),   # w2 (resident, lane-padded)
                pl.BlockSpec((1, H2p), lambda i: (0, 0)),    # b2
                pl.BlockSpec((H2p, Cp), lambda i: (0, 0)),   # w3 (resident, lane-padded)
                pl.BlockSpec((1, Cp), lambda i: (0, 0)),     # b3
            ],
            out_specs=pl.BlockSpec((bt, Cp), lambda i: (i, 0)),
        ),
        compiler_params=pltpu.CompilerParams(
            dimension_semantics=("parallel",)),
        cost_estimate=pl.CostEstimate(
            flops=flops, transcendentals=0, bytes_accessed=bytes_accessed),
    )(x_p, w1, b1, w2, b2, w3, b3)

    return out_padded[:B, :C].astype(jnp.float32)


def init_params(key, num_features, num_classes=5):
    """Deterministic PyTorch-style uniform init: U(-1/sqrt(fan_in), 1/sqrt(fan_in))."""
    dims = [(num_features, 256), (256, 64), (64, num_classes)]
    params = {}
    for idx, (fan_in, fan_out) in enumerate(dims, start=1):
        key, kw, kb = jax.random.split(key, 3)
        bound = 1.0 / (fan_in ** 0.5)
        params[f"w{idx}"] = jax.random.uniform(
            kw, (fan_in, fan_out), jnp.float32, -bound, bound)
        params[f"b{idx}"] = jax.random.uniform(
            kb, (1, fan_out), jnp.float32, -bound, bound)
    return params


def reference_forward(x, params):
    h1 = jnp.maximum(x @ params["w1"] + params["b1"], 0.0)
    h2 = jnp.maximum(h1 @ params["w2"] + params["b2"], 0.0)
    return h2 @ params["w3"] + params["b3"]


if __name__ == "__main__":
    key = jax.random.PRNGKey(0)
    k_param, k_x = jax.random.split(key)

    num_features = 512   # e.g. resnet18 model.fc.in_features
    num_classes = 5
    batch = 8            # small demo batch (kernel pays off for B in the hundreds+)

    params = init_params(k_param, num_features, num_classes)
    prepared = prepare_params(params)
    x = jax.random.normal(k_x, (batch, num_features), jnp.float32)

    out = classifier_forward(x, prepared)
    out = jax.block_until_ready(out)
    assert out.shape == (batch, num_classes), out.shape

    # Reference #1: same bf16-rounded operands, f32 math -> moderate tolerance
    # (kernel additionally rounds the stored logits to bf16).
    params_bf = dict(params)
    for k in ("w1", "w2", "w3"):
        params_bf[k] = params[k].astype(jnp.bfloat16).astype(jnp.float32)
    ref_bf = reference_forward(x.astype(jnp.bfloat16).astype(jnp.float32), params_bf)
    assert jnp.allclose(out, ref_bf, atol=2e-2, rtol=2e-2), "mismatch vs bf16-rounded reference"

    # Reference #2: full-f32 reference -> loose tolerance (bf16 quantization).
    ref_f32 = reference_forward(x, params)
    assert jnp.allclose(out, ref_f32, atol=6e-2, rtol=6e-2), "mismatch vs f32 reference"

    print("KERNEL_OK")
</pallas_src>

<mosaic_0001>
module attributes {stable_mosaic.version = 11 : i64} {
  func.func @_mlp_kernel(%arg0: i32, %arg1: memref<16x512xf32, #tpu.memory_space<vmem>>, %arg2: memref<512x256xbf16, #tpu.memory_space<vmem>>, %arg3: memref<1x256xf32, #tpu.memory_space<vmem>>, %arg4: memref<256x128xbf16, #tpu.memory_space<vmem>>, %arg5: memref<1x128xf32, #tpu.memory_space<vmem>>, %arg6: memref<128x128xbf16, #tpu.memory_space<vmem>>, %arg7: memref<1x128xf32, #tpu.memory_space<vmem>>, %arg8: memref<16x128xbf16, #tpu.memory_space<vmem>>) attributes {dimension_semantics = [#tpu.dimension_semantics<parallel>], iteration_bounds = array<i64: 1>, scalar_prefetch = 0 : i64, scratch_operands = 0 : i64, tpu.core_type = #tpu.core_type<tc>, window_params = [{transform_indices = @transform_0, window_bounds = array<i64: 16, 512>}, {pipeline_mode = #tpu.pipeline_mode<synchronous>, transform_indices = @transform_1, window_bounds = array<i64: 512, 256>}, {pipeline_mode = #tpu.pipeline_mode<synchronous>, transform_indices = @transform_2, window_bounds = array<i64: 1, 256>}, {pipeline_mode = #tpu.pipeline_mode<synchronous>, transform_indices = @transform_3, window_bounds = array<i64: 256, 128>}, {pipeline_mode = #tpu.pipeline_mode<synchronous>, transform_indices = @transform_4, window_bounds = array<i64: 1, 128>}, {pipeline_mode = #tpu.pipeline_mode<synchronous>, transform_indices = @transform_5, window_bounds = array<i64: 128, 128>}, {pipeline_mode = #tpu.pipeline_mode<synchronous>, transform_indices = @transform_6, window_bounds = array<i64: 1, 128>}, {transform_indices = @transform_7, window_bounds = array<i64: 16, 128>}]} {
    %c0 = arith.constant 0 : index
    %c0_0 = arith.constant 0 : index
    %0 = vector.load %arg1[%c0, %c0_0] : memref<16x512xf32, #tpu.memory_space<vmem>>, vector<16x512xf32>
    %1 = arith.truncf %0 : vector<16x512xf32> to vector<16x512xbf16>
    %c0_1 = arith.constant 0 : index
    %c0_2 = arith.constant 0 : index
    %2 = vector.load %arg2[%c0_1, %c0_2] : memref<512x256xbf16, #tpu.memory_space<vmem>>, vector<512x256xbf16>
    %cst = arith.constant dense<0.000000e+00> : vector<16x256xf32>
    %3 = tpu.matmul %1, %2, %cst {dimension_numbers = #tpu.dot_dimension_numbers<[1], [0], [0], [1], [0, 0, 1, 1], [], []>} : vector<16x512xbf16>, vector<512x256xbf16>, vector<16x256xf32> -> vector<16x256xf32>
    %c0_3 = arith.constant 0 : index
    %c0_4 = arith.constant 0 : index
    %4 = vector.load %arg3[%c0_3, %c0_4] : memref<1x256xf32, #tpu.memory_space<vmem>>, vector<1x256xf32>
    %5 = vector.broadcast %4 : vector<1x256xf32> to vector<16x256xf32>
    %6 = arith.addf %3, %5 : vector<16x256xf32>
    %cst_5 = arith.constant 0.000000e+00 : f32
    %7 = vector.broadcast %cst_5 : f32 to vector<16x256xf32>
    %8 = arith.maximumf %6, %7 : vector<16x256xf32>
    %9 = arith.truncf %8 : vector<16x256xf32> to vector<16x256xbf16>
    %c0_6 = arith.constant 0 : index
    %c0_7 = arith.constant 0 : index
    %10 = vector.load %arg4[%c0_6, %c0_7] : memref<256x128xbf16, #tpu.memory_space<vmem>>, vector<256x128xbf16>
    %cst_8 = arith.constant dense<0.000000e+00> : vector<16x128xf32>
    %11 = tpu.matmul %9, %10, %cst_8 {dimension_numbers = #tpu.dot_dimension_numbers<[1], [0], [0], [1], [0, 0, 1, 1], [], []>} : vector<16x256xbf16>, vector<256x128xbf16>, vector<16x128xf32> -> vector<16x128xf32>
    %c0_9 = arith.constant 0 : index
    %c0_10 = arith.constant 0 : index
    %12 = vector.load %arg5[%c0_9, %c0_10] : memref<1x128xf32, #tpu.memory_space<vmem>>, vector<1x128xf32>
    %13 = vector.broadcast %12 : vector<1x128xf32> to vector<16x128xf32>
    %14 = arith.addf %11, %13 : vector<16x128xf32>
    %cst_11 = arith.constant 0.000000e+00 : f32
    %15 = vector.broadcast %cst_11 : f32 to vector<16x128xf32>
    %16 = arith.maximumf %14, %15 : vector<16x128xf32>
    %17 = arith.truncf %16 : vector<16x128xf32> to vector<16x128xbf16>
    %c0_12 = arith.constant 0 : index
    %c0_13 = arith.constant 0 : index
    %18 = vector.load %arg6[%c0_12, %c0_13] : memref<128x128xbf16, #tpu.memory_space<vmem>>, vector<128x128xbf16>
    %cst_14 = arith.constant dense<0.000000e+00> : vector<16x128xf32>
    %19 = tpu.matmul %17, %18, %cst_14 {dimension_numbers = #tpu.dot_dimension_numbers<[1], [0], [0], [1], [0, 0, 1, 1], [], []>} : vector<16x128xbf16>, vector<128x128xbf16>, vector<16x128xf32> -> vector<16x128xf32>
    %c0_15 = arith.constant 0 : index
    %c0_16 = arith.constant 0 : index
    %20 = vector.load %arg7[%c0_15, %c0_16] : memref<1x128xf32, #tpu.memory_space<vmem>>, vector<1x128xf32>
    %21 = vector.broadcast %20 : vector<1x128xf32> to vector<16x128xf32>
    %22 = arith.addf %19, %21 : vector<16x128xf32>
    %23 = arith.truncf %22 : vector<16x128xf32> to vector<16x128xbf16>
    %c0_17 = arith.constant 0 : index
    %c0_18 = arith.constant 0 : index
    %24 = vector.load %arg8[%c0_17, %c0_18] : memref<16x128xbf16, #tpu.memory_space<vmem>>, vector<16x128xbf16>
    tpu.vector_store %arg8[%c0_17, %c0_18], %23 {strides = array<i32>} : memref<16x128xbf16, #tpu.memory_space<vmem>>, vector<16x128xbf16>,
    return
  }
  func.func @transform_0(%arg0: i32) -> (i32, i32) {
    %c0_i32 = arith.constant 0 : i32
    %c0_i32_0 = arith.constant 0 : i32
    return %arg0, %c0_i32 : i32, i32
  }
  func.func @transform_1(%arg0: i32) -> (i32, i32) {
    %c0_i32 = arith.constant 0 : i32
    %c0_i32_0 = arith.constant 0 : i32
    %c0_i32_1 = arith.constant 0 : i32
    return %c0_i32, %c0_i32_0 : i32, i32
  }
  func.func @transform_2(%arg0: i32) -> (i32, i32) {
    %c0_i32 = arith.constant 0 : i32
    %c0_i32_0 = arith.constant 0 : i32
    %c0_i32_1 = arith.constant 0 : i32
    return %c0_i32, %c0_i32_0 : i32, i32
  }
  func.func @transform_3(%arg0: i32) -> (i32, i32) {
    %c0_i32 = arith.constant 0 : i32
    %c0_i32_0 = arith.constant 0 : i32
    %c0_i32_1 = arith.constant 0 : i32
    return %c0_i32, %c0_i32_0 : i32, i32
  }
  func.func @transform_4(%arg0: i32) -> (i32, i32) {
    %c0_i32 = arith.constant 0 : i32
    %c0_i32_0 = arith.constant 0 : i32
    %c0_i32_1 = arith.constant 0 : i32
    return %c0_i32, %c0_i32_0 : i32, i32
  }
  func.func @transform_5(%arg0: i32) -> (i32, i32) {
    %c0_i32 = arith.constant 0 : i32
    %c0_i32_0 = arith.constant 0 : i32
    %c0_i32_1 = arith.constant 0 : i32
    return %c0_i32, %c0_i32_0 : i32, i32
  }
  func.func @transform_6(%arg0: i32) -> (i32, i32) {
    %c0_i32 = arith.constant 0 : i32
    %c0_i32_0 = arith.constant 0 : i32
    %c0_i32_1 = arith.constant 0 : i32
    return %c0_i32, %c0_i32_0 : i32, i32
  }
  func.func @transform_7(%arg0: i32) -> (i32, i32) {
    %c0_i32 = arith.constant 0 : i32
    %c0_i32_0 = arith.constant 0 : i32
    return %arg0, %c0_i32 : i32, i32
  }
}

</mosaic_0001>

<bundles_post_ra>
// kernel: tpu_custom_call.1
= control target key start
LH: loop header
LB: loop body
LE: loop exit
PB: predicated region body
PF: predicated region fallthrough
CT: control target
= control target key end

     0   :  { %12 = vsyncpa [#allocation3], 0  ;;  %s1380_s0 = inlined_call_operand.hbm [shape: f32[16,512], index: 0, kind: input, shape index: {}]   ;;  %s1381_s1 = inlined_call_operand.hbm [shape: bf16[512,256], index: 1, kind: input, shape index: {}]   ;;  %s1382_s2 = inlined_call_operand.vmem [shape: f32[1,256], index: 2, kind: input, shape index: {}]   ;;  %s1383_s3 = inlined_call_operand.hbm [shape: bf16[256,128], index: 3, kind: input, shape index: {}]   ;;  %s1384_s4 = inlined_call_operand.vmem [shape: f32[1,128], index: 4, kind: input, shape index: {}]   ;;  %s1385_s5 = inlined_call_operand.hbm [shape: bf16[128,128], index: 5, kind: input, shape index: {}]   ;;  %s1386_s6 = inlined_call_operand.vmem [shape: f32[1,128], index: 6, kind: input, shape index: {}]   ;;  %s1387_s7 = inlined_call_operand.hbm [shape: bf16[16,128], index: 7, kind: output, shape index: {}]  }
   0x1   :  { %13 = vsyncpa [#allocation6], 0 }
   0x2   :  { %14 = vsyncpa [#allocation9], 0 }
   0x3   :  { %15 = vsyncpa [#allocation4], 0  ;;  %s1294_s24 = smov [#allocation5]  }
   0x4   :  { %s33_s25 = sshll.u32 %s1294_s24, 4  ;;  %s34_s25 = int_to_ptr.vmem [resolvable:$true] %s33_s25 }
   0x5   :  { %s1194_s26 = scalar_lea.vmem %s34_s25, 8192  ;;  %p1199_p1 = scmp.lt.s32.totalorder %s34_s25, %s34_s25 }
   0x6   :  { %p1195_p0 = scmp.ne.s32.totalorder %s34_s25, %s1194_s26  ;;  %p1200_p2 = scmp.lt.s32.totalorder %s1194_s26, %s1194_s26 }
   0x8   :  { %p1201_p3 = por %p1200_p2, %p1199_p1 }
   0xa   :  { %p1202_p4 = pnand %p1201_p3, %p1195_p0 }
   0xc   :  { %1205 = shalt.err (!%p1202_p4)
}
   0xd   :  { %s1295_s27 = smov 128   ;;  %s1296_s28 = smov 8  }
   0xe   :  { %39 = dma.hbm_to_vmem [thread:$0]  %s1381_s1, 8192, %s34_s25, [#allocation6], %s1295_s27, %s1295_s27, %s1296_s28  }
   0xf   :  { %s1297_s8 = smov [#allocation2]  }
  0x10   :  { %s21_s9 = sshll.u32 %s1297_s8, 4  ;;  %s22_s9 = int_to_ptr.vmem [resolvable:$true] %s21_s9 }
  0x11   :  { %s1214_s10 = scalar_lea.vmem %s22_s9, 1024  ;;  %p1219_p6 = scmp.lt.s32.totalorder %s22_s9, %s22_s9 }
  0x12   :  { %p1215_p5 = scmp.ne.s32.totalorder %s22_s9, %s1214_s10  ;;  %p1220_p7 = scmp.lt.s32.totalorder %s1214_s10, %s1214_s10 }
  0x14   :  { %p1221_p8 = por %p1220_p7, %p1219_p6 }
  0x16   :  { %p1222_p9 = pnand %p1221_p8, %p1215_p5 }
  0x18   :  { %1225 = shalt.err (!%p1222_p9)
}
  0x19   :  { %s1298_s11 = smov 512   ;;  %s1299_s12 = smov 32  }
  0x1a   :  { %27 = dma.hbm_to_vmem [thread:$0]  %s1380_s0, 1024, %s22_s9, [#allocation3], %s1298_s11, %s1298_s11, %s1299_s12  }
  0x1b   :  { %s1300_s15 = smov [#allocation7]  }
  0x1c   :  { %s47_s16 = sshll.u32 %s1300_s15, 4  ;;  %s48_s16 = int_to_ptr.vmem [resolvable:$true] %s47_s16 }
  0x1d   :  { %s1234_s1 = scalar_lea.vmem %s48_s16, 2048  ;;  %p1239_p11 = scmp.lt.s32.totalorder %s48_s16, %s48_s16 }
  0x1e   :  { %p1235_p10 = scmp.ne.s32.totalorder %s48_s16, %s1234_s1  ;;  %p1240_p12 = scmp.lt.s32.totalorder %s1234_s1, %s1234_s1 }
  0x20   :  { %p1241_p13 = por %p1240_p12, %p1239_p11 }
  0x22   :  { %p1242_p0 = pnand %p1241_p13, %p1235_p10 }
  0x24   :  { %1245 = shalt.err (!%p1242_p0)
}
  0x25   :  { %s1301_s17 = smov 64   ;;  %s1302_s18 = smov 4  }
  0x26   :  { %53 = dma.hbm_to_vmem [thread:$0]  %s1383_s3, 2048, %s48_s16, [#allocation6], %s1301_s17, %s1301_s17, %s1302_s18  }
  0x27   :  { %s1303_s0 = smov [#allocation8]  }
  0x28   :  { %s61_s21 = sshll.u32 %s1303_s0, 4  ;;  %s62_s21 = int_to_ptr.vmem [resolvable:$true] %s61_s21 }
  0x29   :  { %s1254_s22 = scalar_lea.vmem %s62_s21, 1024  ;;  %p1259_p2 = scmp.lt.s32.totalorder %s62_s21, %s62_s21 }
  0x2a   :  { %p1255_p1 = scmp.ne.s32.totalorder %s62_s21, %s1254_s22  ;;  %p1260_p3 = scmp.lt.s32.totalorder %s1254_s22, %s1254_s22 }
  0x2c   :  { %p1261_p4 = por %p1260_p3, %p1259_p2 }
  0x2e   :  { %p1262_p5 = pnand %p1261_p4, %p1255_p1 }
  0x30   :  { %1265 = shalt.err (!%p1262_p5)
}
  0x31   :  { %67 = dma.hbm_to_vmem [thread:$0]  %s1385_s5, 1024, %s62_s21, [#allocation9], %s1301_s17, %s1301_s17, %s1302_s18  }
  0x32   :  { %1286 = dma.done.wait [#allocation3], 1024  }
  0x33   :  { %1287 = vsyncadd [#allocation3], 4294966272 }
  0x34   :  { %1288 = dma.done.wait [#allocation6], 10240  }
  0x35   :  { %1289 = vsyncadd [#allocation6], 4294957056 }
  0x36   :  { %1290 = dma.done.wait [#allocation9], 1024  }
  0x37   :  { %1291 = vsyncadd [#allocation9], 4294966272  ;;  %v1066_v0 = vld [vmem:[#allocation5 + $0x74] ss:$8 sps:$4 sm:$0xff]   ;;  %v1070_v2 = vld [vmem:[#allocation5 + $0x70] ss:$8 sps:$4 sm:$0xff]  }
  0x38   :  { %v1068_v1 = vld [vmem:[#allocation5 + $0x174] ss:$8 sps:$4 sm:$0xff]   ;;  %491 = vmatprep.subr.bf16.mxu0 %v1066_v0  ;;  %v1071_v3 = vld [vmem:[#allocation5 + $0x170] ss:$8 sps:$4 sm:$0xff]   ;;  %v1072_v4 = vld [vmem:[#allocation5 + $0x64] ss:$8 sps:$4 sm:$0xff]  }
  0x39   :  { %534 = vmatprep.subr.bf16.mxu1 %v1068_v1  ;;  %492 = vmatpush1.bf16.msra.mxu0 %v1070_v2  ;;  %v1074_v5 = vld [vmem:[#allocation5 + $0x164] ss:$8 sps:$4 sm:$0xff]   ;;  %v1076_v6 = vld [vmem:[#allocation5 + $0x60] ss:$8 sps:$4 sm:$0xff]   ;;  %v1078_v8 = vld [vmem:[#allocation5 + $0x54] ss:$8 sps:$4 sm:$0xff]  }
  0x3a   :  { %535 = vmatpush1.bf16.msra.mxu1 %v1071_v3  ;;  %493 = vmatprep.subr.bf16.mxu0 %v1072_v4  ;;  %v1077_v7 = vld [vmem:[#allocation5 + $0x160] ss:$8 sps:$4 sm:$0xff]   ;;  %v1080_v9 = vld [vmem:[#allocation5 + $0x154] ss:$8 sps:$4 sm:$0xff]   ;;  %v1082_v10 = vld [vmem:[#allocation5 + $0x50] ss:$8 sps:$4 sm:$0xff]  }
  0x3b   :  { %536 = vmatprep.subr.bf16.mxu1 %v1074_v5  ;;  %v1083_v11 = vld [vmem:[#allocation5 + $0x150] ss:$8 sps:$4 sm:$0xff]   ;;  %v1084_v12 = vld [vmem:[#allocation5 + $0x44] ss:$8 sps:$4 sm:$0xff]   ;;  %v1088_v14 = vld [vmem:[#allocation5 + $0x40] ss:$8 sps:$4 sm:$0xff]  }
  0x3c   :  { %v1086_v13 = vld [vmem:[#allocation5 + $0x144] ss:$8 sps:$4 sm:$0xff]   ;;  %v1089_v15 = vld [vmem:[#allocation5 + $0x140] ss:$8 sps:$4 sm:$0xff]   ;;  %v1090_v16 = vld [vmem:[#allocation5 + $0x34] ss:$8 sps:$4 sm:$0xff]  }
  0x3d   :  { %494 = vmatpush1.bf16.msra.mxu0 %v1076_v6  ;;  %v1092_v17 = vld [vmem:[#allocation5 + $0x134] ss:$8 sps:$4 sm:$0xff]   ;;  %v1094_v18 = vld [vmem:[#allocation5 + $0x30] ss:$8 sps:$4 sm:$0xff]   ;;  %v1096_v20 = vld [vmem:[#allocation5 + $0x24] ss:$8 sps:$4 sm:$0xff]  }
  0x3e   :  { %537 = vmatpush1.bf16.msra.mxu1 %v1077_v7  ;;  %495 = vmatprep.subr.bf16.mxu0 %v1078_v8  ;;  %v1095_v19 = vld [vmem:[#allocation5 + $0x130] ss:$8 sps:$4 sm:$0xff]   ;;  %v1098_v21 = vld [vmem:[#allocation5 + $0x124] ss:$8 sps:$4 sm:$0xff]   ;;  %v1100_v22 = vld [vmem:[#allocation5 + $0x20] ss:$8 sps:$4 sm:$0xff]  }
  0x3f   :  { %538 = vmatprep.subr.bf16.mxu1 %v1080_v9  ;;  %v1101_v23 = vld [vmem:[#allocation5 + $0x120] ss:$8 sps:$4 sm:$0xff]   ;;  %v1102_v24 = vld [vmem:[#allocation5 + $0x14] ss:$8 sps:$4 sm:$0xff]   ;;  %v1106_v26 = vld [vmem:[#allocation5 + $0x10] ss:$8 sps:$4 sm:$0xff]  }
  0x40   :  { %v1104_v25 = vld [vmem:[#allocation5 + $0x114] ss:$8 sps:$4 sm:$0xff]   ;;  %v1107_v27 = vld [vmem:[#allocation5 + $0x110] ss:$8 sps:$4 sm:$0xff]   ;;  %v1108_v28 = vld [vmem:[#allocation5 + $0x4] ss:$8 sps:$4 sm:$0xff]  }
  0x41   :  { %496 = vmatpush1.bf16.msra.mxu0 %v1082_v10  ;;  %v1110_v29 = vld [vmem:[#allocation5 + $0x104] ss:$8 sps:$4 sm:$0xff]   ;;  %v1112_v30 = vld [vmem:[#allocation5] ss:$8 sps:$4 sm:$0xff]   ;;  %v1114_v32 = vld [vmem:[#allocation5 + $0xf4] ss:$8 sps:$4 sm:$0xff]  }
  0x42   :  { %539 = vmatpush1.bf16.msra.mxu1 %v1083_v11  ;;  %497 = vmatprep.subr.bf16.mxu0 %v1084_v12  ;;  %v1113_v31 = vld [vmem:[#allocation5 + $0x100] ss:$8 sps:$4 sm:$0xff]   ;;  %v1116_v33 = vld [vmem:[#allocation5 + $0x1f4] ss:$8 sps:$4 sm:$0xff]   ;;  %v1118_v34 = vld [vmem:[#allocation5 + $0xf0] ss:$8 sps:$4 sm:$0xff]  }
  0x43   :  { %540 = vmatprep.subr.bf16.mxu1 %v1086_v13  ;;  %v1119_v35 = vld [vmem:[#allocation5 + $0x1f0] ss:$8 sps:$4 sm:$0xff]   ;;  %v1120_v36 = vld [vmem:[#allocation5 + $0xe4] ss:$8 sps:$4 sm:$0xff]   ;;  %v1124_v38 = vld [vmem:[#allocation5 + $0xe0] ss:$8 sps:$4 sm:$0xff]  }
  0x44   :  { %v1122_v37 = vld [vmem:[#allocation5 + $0x1e4] ss:$8 sps:$4 sm:$0xff]   ;;  %v1125_v39 = vld [vmem:[#allocation5 + $0x1e0] ss:$8 sps:$4 sm:$0xff]   ;;  %v1126_v40 = vld [vmem:[#allocation5 + $0xd4] ss:$8 sps:$4 sm:$0xff]  }
  0x45   :  { %498 = vmatpush1.bf16.msra.mxu0 %v1088_v14  ;;  %v1128_v41 = vld [vmem:[#allocation5 + $0x1d4] ss:$8 sps:$4 sm:$0xff]   ;;  %v1130_v42 = vld [vmem:[#allocation5 + $0xd0] ss:$8 sps:$4 sm:$0xff]   ;;  %v1132_v44 = vld [vmem:[#allocation5 + $0xc4] ss:$8 sps:$4 sm:$0xff]  }
  0x46   :  { %541 = vmatpush1.bf16.msra.mxu1 %v1089_v15  ;;  %499 = vmatprep.subr.bf16.mxu0 %v1090_v16  ;;  %v1131_v43 = vld [vmem:[#allocation5 + $0x1d0] ss:$8 sps:$4 sm:$0xff]   ;;  %v1134_v45 = vld [vmem:[#allocation5 + $0x1c4] ss:$8 sps:$4 sm:$0xff]   ;;  %v1136_v50 = vld [vmem:[#allocation5 + $0xc0] ss:$8 sps:$4 sm:$0xff]  }
  0x47   :  { %542 = vmatprep.subr.bf16.mxu1 %v1092_v17  ;;  %v84_v46 = vld [vmem:[#allocation2 + $0x8] sm:$0xff]  ;;  %v86_v48 = vld [vmem:[#allocation2 + $0x18] sm:$0xff]  ;;  %v83_v6 = vld [vmem:[#allocation2] sm:$0xff]  ;;  %vm1305_vm0 = vmmov 0   ;;  %s1306_s28 = smov [#allocation10]  }
  0x48   :  { %v88_v47 = vld [vmem:[#allocation2 + $0x28] sm:$0xff]  ;;  %v90_v49 = vld [vmem:[#allocation2 + $0x38] sm:$0xff]  ;;  %v87_v7 = vld [vmem:[#allocation2 + $0x20] sm:$0xff]  ;;  %s889_s29 = sshll.u32 %s1306_s28, 4  ;;  %s890_s29 = int_to_ptr.vmem [resolvable:$true] %s889_s29 }
  0x49   :  { %500 = vmatpush1.bf16.msra.mxu0 %v1094_v18  ;;  %v1137_v51 = vld [vmem:[#allocation5 + $0x1c0] ss:$8 sps:$4 sm:$0xff]   ;;  %v1138_v52 = vld [vmem:[#allocation5 + $0xb4] ss:$8 sps:$4 sm:$0xff]   ;;  %v92_v53 = vpack.c.bf16 %v88_v47, %v84_v46  ;;  %v94_v54 = vpack.c.bf16 %v90_v49, %v86_v48  ;;  %v1142_v56 = vld [vmem:[#allocation5 + $0xb0] ss:$8 sps:$4 sm:$0xff]   ;;  %v91_v11 = vpack.c.bf16 %v87_v7, %v83_v6  ;;  %p1271_p7 = scmp.lt.s32.totalorder %s890_s29, %s890_s29 }
  0x4a   :  { %543 = vmatpush1.bf16.msra.mxu1 %v1095_v19  ;;  %501 = vmatprep.subr.bf16.mxu0 %v1096_v20  ;;  %v1140_v55 = vld [vmem:[#allocation5 + $0x1b4] ss:$8 sps:$4 sm:$0xff]   ;;  %v1143_v57 = vld [vmem:[#allocation5 + $0x1b0] ss:$8 sps:$4 sm:$0xff]   ;;  %v1144_v58 = vld [vmem:[#allocation5 + $0xa4] ss:$8 sps:$4 sm:$0xff]  }
  0x4b   :  { %544 = vmatprep.subr.bf16.mxu1 %v1098_v21  ;;  %523 = vmatprep.mubr.bf16.mxu0 %v92_v53  ;;  %v1146_v59 = vld [vmem:[#allocation5 + $0x1a4] ss:$8 sps:$4 sm:$0xff]   ;;  %v1148_v60 = vld [vmem:[#allocation5 + $0xa0] ss:$8 sps:$4 sm:$0xff]   ;;  %v1150_v62 = vld [vmem:[#allocation5 + $0x94] ss:$8 sps:$4 sm:$0xff]  }
  0x4c   :  { %566 = vmatprep.mubr.bf16.mxu1 %v94_v54  ;;  %v1149_v61 = vld [vmem:[#allocation5 + $0x1a0] ss:$8 sps:$4 sm:$0xff]   ;;  %v1152_v63 = vld [vmem:[#allocation5 + $0x194] ss:$8 sps:$4 sm:$0xff]   ;;  %v1154_v0 = vld [vmem:[#allocation5 + $0x90] ss:$8 sps:$4 sm:$0xff]  }
  0x4d   :  { %502 = vmatpush1.bf16.msra.mxu0 %v1100_v22  ;;  %v1155_v1 = vld [vmem:[#allocation5 + $0x190] ss:$8 sps:$4 sm:$0xff]   ;;  %v1156_v2 = vld [vmem:[#allocation5 + $0x84] ss:$8 sps:$4 sm:$0xff]   ;;  %v1160_v4 = vld [vmem:[#allocation5 + $0x80] ss:$8 sps:$4 sm:$0xff]  }
  0x4e   :  { %545 = vmatpush1.bf16.msra.mxu1 %v1101_v23  ;;  %503 = vmatprep.subr.bf16.mxu0 %v1102_v24  ;;  %v1158_v3 = vld [vmem:[#allocation5 + $0x184] ss:$8 sps:$4 sm:$0xff]   ;;  %v1161_v5 = vld [vmem:[#allocation5 + $0x180] ss:$8 sps:$4 sm:$0xff]   ;;  %v85_v8 = vld [vmem:[#allocation2 + $0x10] sm:$0xff] }
  0x4f   :  { %546 = vmatprep.subr.bf16.mxu1 %v1104_v25  ;;  %v89_v9 = vld [vmem:[#allocation2 + $0x30] sm:$0xff]  ;;  %v1162_v10 = vld [vmem:[#allocation7 + $0x78] sm:$0xff]   ;;  %v1166_v16 = vld [vmem:[#allocation7 + $0x68] sm:$0xff]  }
  0x50   :  { %v93_v12 = vpack.c.bf16 %v89_v9, %v85_v8  ;;  %v1163_v13 = vld [vmem:[#allocation7 + $0x38] sm:$0xff]   ;;  %v1164_v14 = vld [vmem:[#allocation7 + $0x70] sm:$0xff]   ;;  %v1167_v17 = vld [vmem:[#allocation7 + $0x28] sm:$0xff]  }
  0x51   :  { %504 = vmatpush1.bf16.msra.mxu0 %v1106_v26  ;;  %v1165_v15 = vld [vmem:[#allocation7 + $0x30] sm:$0xff]   ;;  %v1168_v18 = vld [vmem:[#allocation7 + $0x60] sm:$0xff]   ;;  %v1170_v20 = vld [vmem:[#allocation7 + $0x58] sm:$0xff]  }
  0x52   :  { %547 = vmatpush1.bf16.msra.mxu1 %v1107_v27  ;;  %505 = vmatprep.subr.bf16.mxu0 %v1108_v28  ;;  %v1169_v19 = vld [vmem:[#allocation7 + $0x20] sm:$0xff]   ;;  %v1171_v21 = vld [vmem:[#allocation7 + $0x18] sm:$0xff]   ;;  %v1172_v22 = vld [vmem:[#allocation7 + $0x50] sm:$0xff]  }
  0x53   :  { %548 = vmatprep.subr.bf16.mxu1 %v1110_v29  ;;  %v1173_v23 = vld [vmem:[#allocation7 + $0x10] sm:$0xff]   ;;  %v1174_v24 = vld [vmem:[#allocation7 + $0x48] sm:$0xff]   ;;  %v1176_v26 = vld [vmem:[#allocation7 + $0x40] sm:$0xff]   ;;  %v1304_v29 = vmov 0.0  }
  0x54   :  { %v1175_v25 = vld [vmem:[#allocation7 + $0x8] sm:$0xff]   ;;  %v1177_v27 = vld [vmem:[#allocation7] sm:$0xff]   ;;  %v1178_v28 = vld [vmem:[#allocation8 + $0x38] sm:$0xff]  }
  0x55   :  { %506 = vmatpush1.bf16.msra.mxu0 %v1112_v30  ;;  %v1179_v30 = vld [vmem:[#allocation8 + $0x30] sm:$0xff]  }
  0x56   :  { %549 = vmatpush1.bf16.msra.mxu1 %v1113_v31  ;;  %507 = vmatprep.subr.bf16.mxu0 %v1114_v32  ;;  %v1180_v31 = vld [vmem:[#allocation8 + $0x28] sm:$0xff]   ;;  %v1181_v32 = vld [vmem:[#allocation8 + $0x20] sm:$0xff]  }
  0x57   :  { %550 = vmatprep.subr.bf16.mxu1 %v1116_v33  ;;  %v161_v33 = vlaneseq }
  0x59   :  { %508 = vmatpush2.bf16.msra.mxu0 %v1118_v34  ;;  %v162_v34 = vshrl.u32 %v161_v33, 7 }
  0x5a   :  { %551 = vmatpush2.bf16.msra.mxu1 %v1119_v35  ;;  %509 = vmatprep.subr.bf16.mxu0 %v1120_v36 }
  0x5b   :  { %552 = vmatprep.subr.bf16.mxu1 %v1122_v37  ;;  %v167_v35 = vsub.s32 1, %v162_v34  ;;  %v163_v36 = vsub.s32 0, %v162_v34  ;;  %v159_v37 = vld [vmem:[%s1382_s2] sm:$0x3] }
  0x5d   :  { %510 = vmatpush2.bf16.msra.mxu0 %v1124_v38  ;;  %v168_v38 = vrot.slane %v159_v37, %v167_v35 }
  0x5e   :  { %553 = vmatpush2.bf16.msra.mxu1 %v1125_v39  ;;  %511 = vmatprep.subr.bf16.mxu0 %v1126_v40  ;;  %v164_v39 = vrot.slane %v159_v37, %v163_v36 }
  0x5f   :  { %554 = vmatprep.subr.bf16.mxu1 %v1128_v41 }
  0x61   :  { %512 = vmatpush2.bf16.msra.mxu0 %v1130_v42 }
  0x62   :  { %555 = vmatpush2.bf16.msra.mxu1 %v1131_v43  ;;  %513 = vmatprep.subr.bf16.mxu0 %v1132_v44 }
  0x63   :  { %556 = vmatprep.subr.bf16.mxu1 %v1134_v45 }
  0x65   :  { %514 = vmatpush2.bf16.msra.mxu0 %v1136_v50 }
  0x66   :  { %557 = vmatpush2.bf16.msra.mxu1 %v1137_v51  ;;  %515 = vmatprep.subr.bf16.mxu0 %v1138_v52 }
  0x67   :  { %558 = vmatprep.subr.bf16.mxu1 %v1140_v55 }
  0x69   :  { %516 = vmatpush2.bf16.msra.mxu0 %v1142_v56 }
  0x6a   :  { %559 = vmatpush2.bf16.msra.mxu1 %v1143_v57  ;;  %517 = vmatprep.subr.bf16.mxu0 %v1144_v58 }
  0x6b   :  { %560 = vmatprep.subr.bf16.mxu1 %v1146_v59 }
  0x6d   :  { %518 = vmatpush2.bf16.msra.mxu0 %v1148_v60 }
  0x6e   :  { %561 = vmatpush2.bf16.msra.mxu1 %v1149_v61  ;;  %519 = vmatprep.subr.bf16.mxu0 %v1150_v62  ;;  %v1182_v62 = vld [vmem:[#allocation8 + $0x18] sm:$0xff]  }
  0x6f   :  { %562 = vmatprep.subr.bf16.mxu1 %v1152_v63  ;;  %v1183_v63 = vld [vmem:[#allocation8 + $0x10] sm:$0xff]  }
  0x71   :  { %520 = vmatpush2.bf16.msra.mxu0 %v1154_v0  ;;  %v1184_v0 = vld [vmem:[#allocation8 + $0x8] sm:$0xff]  }
  0x72   :  { %563 = vmatpush2.bf16.msra.mxu1 %v1155_v1  ;;  %521 = vmatprep.subr.bf16.mxu0 %v1156_v2  ;;  %v1185_v1 = vld [vmem:[#allocation8] sm:$0xff]  }
  0x73   :  { %564 = vmatprep.subr.bf16.mxu1 %v1158_v3 }
  0x75   :  { %522 = vmatpush2.bf16.msra.mxu0 %v1160_v4 }
  0x76   :  { %565 = vmatpush2.bf16.msra.mxu1 %v1161_v5  ;;  %1002 = vmatprep.subr.bf16.mxu0 %v1162_v10  ;;  %v967_v5 = vld [vmem:[%s1384_s4] ss:$0 sm:$0xff]  ;;  %s1266_s4 = scalar_lea.vmem %s890_s29, 128 }
  0x77   :  { %1033 = vmatprep.subr.bf16.mxu1 %v1304_v29  ;;  %p1267_p6 = scmp.ne.s32.totalorder %s890_s29, %s1266_s4  ;;  %p1272_p8 = scmp.lt.s32.totalorder %s1266_s4, %s1266_s4 }
  0x78   :  { %524 = vmatmul.mubr.bf16.vlgmr.msra.gmra.mxu0 %v91_v11 }
  0x79   :  { %567 = vmatmul.mubr.bf16.vlgmr.msra.gmra.mxu1 %v93_v12  ;;  %1003 = vmatpush3.bf16.msra.mxu0 %v1163_v13  ;;  %p1273_p9 = por %p1272_p8, %p1271_p7 }
  0x7a   :  { %1004 = vmatprep.subr.bf16.mxu0 %v1164_v14  ;;  %1034 = vmatpush3.bf16.msra.mxu1 %v1178_v28 }
  0x7b   :  { %1035 = vmatprep.subr.bf16.mxu1 %v1304_v29  ;;  %1049 = vmatprep.mubr.msk.bf16.mxu1 %vm1305_vm0, %v1304_v29  ;;  %p1274_p10 = pnand %p1273_p9, %p1267_p6 }
  0x7d   :  { %1005 = vmatpush3.bf16.msra.mxu0 %v1165_v15  ;;  %v984_v15 = vld [vmem:[%s1386_s6] ss:$0 sm:$0xff] }
  0x7e   :  { %1006 = vmatprep.subr.bf16.mxu0 %v1166_v16  ;;  %1036 = vmatpush3.bf16.msra.mxu1 %v1179_v30 }
  0x7f   :  { %1037 = vmatprep.subr.bf16.mxu1 %v1304_v29 }
  0x81   :  { %1007 = vmatpush3.bf16.msra.mxu0 %v1167_v17 }
  0x82   :  { %1008 = vmatprep.subr.bf16.mxu0 %v1168_v18  ;;  %1038 = vmatpush3.bf16.msra.mxu1 %v1180_v31 }
  0x83   :  { %1039 = vmatprep.subr.bf16.mxu1 %v1304_v29 }
  0x85   :  { %1009 = vmatpush3.bf16.msra.mxu0 %v1169_v19 }
  0x86   :  { %1010 = vmatprep.subr.bf16.mxu0 %v1170_v20  ;;  %1040 = vmatpush3.bf16.msra.mxu1 %v1181_v32 }
  0x87   :  { %1041 = vmatprep.subr.bf16.mxu1 %v1304_v29 }
  0x89   :  { %1011 = vmatpush3.bf16.msra.mxu0 %v1171_v21 }
  0x8a   :  { %1012 = vmatprep.subr.bf16.mxu0 %v1172_v22  ;;  %1042 = vmatpush3.bf16.msra.mxu1 %v1182_v62 }
  0x8b   :  { %1043 = vmatprep.subr.bf16.mxu1 %v1304_v29 }
  0x8d   :  { %1013 = vmatpush3.bf16.msra.mxu0 %v1173_v23 }
  0x8e   :  { %1014 = vmatprep.subr.bf16.mxu0 %v1174_v24  ;;  %1044 = vmatpush3.bf16.msra.mxu1 %v1183_v63 }
  0x8f   :  { %1045 = vmatprep.subr.bf16.mxu1 %v1304_v29 }
  0x91   :  { %1015 = vmatpush3.bf16.msra.mxu0 %v1175_v25 }
  0x92   :  { %1016 = vmatprep.subr.bf16.mxu0 %v1176_v26  ;;  %1046 = vmatpush3.bf16.msra.mxu1 %v1184_v0 }
  0x93   :  { %1047 = vmatprep.subr.bf16.mxu1 %v1304_v29 }
  0x95   :  { %1017 = vmatpush3.bf16.msra.mxu0 %v1177_v27 }
  0x96   :  { %1048 = vmatpush3.bf16.msra.mxu1 %v1185_v1 }
 0x138   :  { %v525_v40 = vpop.f32.mrf.mxu0 }
 0x139   :  { %v568_v41 = vpop.f32.mrf.mxu1  ;;  %v526_v45 = vadd.f32 %v525_v40, %v164_v39 }
 0x13a   :  { %v527_v42 = vpop.f32.mrf.mxu0 }
 0x13b   :  { %v570_v43 = vpop.f32.mrf.mxu1  ;;  %v528_v44 = vadd.f32 %v527_v42, %v168_v38  ;;  %v569_v53 = vadd.f32 %v568_v41, %v526_v45 }
 0x13c   :  { %v529_v46 = vpop.f32.mrf.mxu0 }
 0x13d   :  { %v572_v47 = vpop.f32.mrf.mxu1  ;;  %v530_v48 = vadd.f32 %v529_v46, %v164_v39  ;;  %v571_v50 = vadd.f32 %v570_v43, %v528_v44  ;;  %v577_v59 = vmax.f32 %v569_v53, 0.0 }
 0x13e   :  { %v531_v49 = vpop.f32.mrf.mxu0 }
 0x13f   :  { %v573_v51 = vadd.f32 %v572_v47, %v530_v48  ;;  %v532_v52 = vadd.f32 %v531_v49, %v168_v38  ;;  %v574_v54 = vpop.f32.mrf.mxu1  ;;  %v578_v57 = vmax.f32 %v571_v50, 0.0 }
 0x141   :  { %v575_v55 = vadd.f32 %v574_v54, %v532_v52  ;;  %v579_v56 = vmax.f32 %v573_v51, 0.0 }
 0x143   :  { %v580_v58 = vmax.f32 %v575_v55, 0.0  ;;  %v581_v61 = vpack.c.bf16 %v579_v56, %v577_v59 }
 0x145   :  { %v582_v60 = vpack.c.bf16 %v580_v58, %v578_v57 }
 0x147   :  { %750 = vmatprep.mubr.bf16.mxu0 %v582_v60 }
 0x148   :  { %751 = vmatmul.mubr.bf16.vlgmr.msra.gmra.mxu0 %v581_v61 }
 0x208   :  { %v1018_v2 = vpop.f32.mrf.mxu0 }
 0x20a   :  { %v1019_v3 = vpop.f32.mrf.mxu0 }
 0x20b   :  { %v1020_v4 = vadd.f32 %v1019_v3, %v1018_v2 }
 0x20c   :  { %v1021_v6 = vpop.f32.mrf.mxu0 }
 0x20d   :  { %v753_v8 = vadd.f32 %v1020_v4, %v967_v5 }
 0x20e   :  { %v1022_v7 = vpop.f32.mrf.mxu0 }
 0x20f   :  { %v1023_v9 = vadd.f32 %v1022_v7, %v1021_v6  ;;  %v759_v11 = vmax.f32 %v753_v8, 0.0 }
 0x211   :  { %v756_v10 = vadd.f32 %v1023_v9, %v967_v5 }
 0x213   :  { %v760_v12 = vmax.f32 %v756_v10, 0.0 }
 0x215   :  { %v761_v13 = vpack.c.bf16 %v760_v12, %v759_v11 }
 0x217   :  { %1050 = vmatmul.mubr.bf16.vlgmr.msra.gmra.mxu1 %v761_v13 }
 0x2d7   :  { %v867_v14 = vpop.f32.mrf.mxu1 }
 0x2d8   :  { %v868_v18 = vadd.f32 %v984_v15, %v867_v14 }
 0x2d9   :  { %v1051_v16 = vpop.f32.mrf.mxu1 }
 0x2db   :  { %v870_v17 = vpop.f32.mrf.mxu1 }
 0x2dc   :  { %v871_v19 = vadd.f32 %v984_v15, %v870_v17 }
 0x2dd   :  { %v1052_v20 = vpop.f32.mrf.mxu1 }
 0x2de   :  { %v1000_v21 = vpack.c.bf16 %v871_v19, %v868_v18 }
 0x2e0   :  { %1001 = vst [vmem:[#allocation10] sm:$0xff] %v1000_v21  }
 0x2e1   :  { %1277 = shalt.err (!%p1274_p10)
}
 0x2e2   :  { %895 = dma.vmem_to_hbm [thread:$0]  %s890_s29, 128, %s1387_s7, [#allocation4], %s1301_s17, %s1301_s17, %s1302_s18  }
 0x2e3   :  { %1292 = dma.done.wait [#allocation4], 128  }
 0x2e4   :  { %1293 = vsyncadd [#allocation4], 4294967168 }
 0x2e5   :  { %899 = vsyncpa [#allocation3], 1 }
 0x2e6   :  { %900 = vsyncpa [#allocation6], 1 }
 0x2e7   :  { %901 = vsyncpa [#allocation9], 1 }
 0x2e8   :  { %902 = vsyncpa [#allocation4], 1 }

</bundles_post_ra>
